<compile_context>
chip_gen: v6e
topology: v6e:2x2x1
jax: 0.10.0
libtpu: 0.0.40
codegen_flags: <defaults>
</compile_context>

<pallas_src>
import jax
import jax.numpy as jnp
from jax.experimental import pallas as pl
from jax.experimental.pallas import tpu as pltpu


_HIDDEN = 128          # hidden width of the first Linear (fixed by the module)
_LANE = 128            # TPU lane width
_SUBLANE_BF16 = 16     # bf16 sublane packing -> batch tiles are multiples of 16


def _round_up(x, m):
    return (x + m - 1) // m * m


def mlp_kernel(x_ref, w1_ref, b1_ref, w2_ref, b2_ref, o_ref):
    # Fused Linear -> ReLU -> Linear on one batch tile.
    # bf16 operands feed the MXU; accumulation stays in f32.
    h = jnp.dot(x_ref[...], w1_ref[...], preferred_element_type=jnp.float32)
    h = jnp.maximum(h + b1_ref[...], 0.0)
    y = jnp.dot(h.astype(w2_ref.dtype), w2_ref[...],
                preferred_element_type=jnp.float32) + b2_ref[...]
    o_ref[...] = y.astype(o_ref.dtype)


def image_encoder_forward(x, w1, b1, w2, b2, *, bm=None,
                          vmem_budget_bytes=16 << 20):
    """x: [B, input_dim] f32; w1: [input_dim, 128]; b1: [128];
    w2: [128, shared_dim]; b2: [shared_dim]. Returns [B, shared_dim] f32."""
    B, input_dim = x.shape
    hidden = w1.shape[1]
    shared_dim = w2.shape[1]

    # --- lane-dense output: pad shared_dim up to a multiple of 128 -----------
    shared_p = _round_up(shared_dim, _LANE)
    b1 = b1.reshape(1, -1)
    b2 = b2.reshape(1, -1)
    if shared_p != shared_dim:
        w2 = jnp.pad(w2, ((0, 0), (0, shared_p - shared_dim)))
        b2 = jnp.pad(b2, ((0, 0), (0, shared_p - shared_dim)))

    # --- bf16 MXU operands, f32 biases ---------------------------------------
    x_bf = x.astype(jnp.bfloat16)
    w1_bf = w1.astype(jnp.bfloat16)
    w2_bf = w2.astype(jnp.bfloat16)
    b1_f = b1.astype(jnp.float32)
    b2_f = b2.astype(jnp.float32)

    # --- batch-tile selection under a VMEM budget -----------------------------
    per_row = (input_dim * 2 * 2      # x tile (bf16, double-buffered)
               + shared_p * 4 * 2     # out tile (f32, double-buffered)
               + hidden * 4)          # live f32 intermediate
    weight_bytes = ((input_dim * hidden + hidden * shared_p) * 2  # bf16 weights
                    + (hidden + shared_p) * 4)                    # f32 biases
    if bm is None:
        avail = max(vmem_budget_bytes - weight_bytes, per_row * _SUBLANE_BF16)
        bm = max(_SUBLANE_BF16,
                 min(512,
                     (avail // per_row) // _SUBLANE_BF16 * _SUBLANE_BF16,
                     _round_up(B, _SUBLANE_BF16)))
    elif bm % _SUBLANE_BF16 != 0:
        raise ValueError("bm must be a multiple of 16 (bf16 sublane packing)")

    # --- pad batch so every grid step sees a full tile ------------------------
    B_pad = _round_up(B, bm)
    if B_pad != B:
        x_bf = jnp.pad(x_bf, ((0, B_pad - B), (0, 0)))
    grid = (B_pad // bm,)

    # --- explicit scoped-VMEM limit with headroom -----------------------------
    vmem_est = (bm * input_dim * 2 * 2
                + bm * shared_p * 4 * 2
                + 2 * bm * hidden * 4
                + weight_bytes)
    vmem_limit = min(max(int(vmem_est * 1.5) + (4 << 20), 16 << 20), 48 << 20)

    # grid-invariant operands: single VMEM copy instead of double-buffering
    w_mode = pl.Buffered(1)

    out = pl.pallas_call(
        mlp_kernel,
        out_shape=jax.ShapeDtypeStruct((B_pad, shared_p), jnp.float32),
        grid_spec=pltpu.PrefetchScalarGridSpec(
            num_scalar_prefetch=0,
            grid=grid,
            in_specs=[
                pl.BlockSpec((bm, input_dim), lambda i: (i, 0)),     # x tile
                pl.BlockSpec((input_dim, hidden), lambda i: (0, 0),
                             pipeline_mode=w_mode),                  # W1
                pl.BlockSpec((1, hidden), lambda i: (0, 0),
                             pipeline_mode=w_mode),                  # b1
                pl.BlockSpec((hidden, shared_p), lambda i: (0, 0),
                             pipeline_mode=w_mode),                  # W2 (padded)
                pl.BlockSpec((1, shared_p), lambda i: (0, 0),
                             pipeline_mode=w_mode),                  # b2 (padded)
            ],
            out_specs=pl.BlockSpec((bm, shared_p), lambda i: (i, 0)),
        ),
        compiler_params=pltpu.CompilerParams(
            dimension_semantics=("parallel",),
            vmem_limit_bytes=vmem_limit),
    )(x_bf, w1_bf, b1_f, w2_bf, b2_f)

    # slice off batch padding and the lane-padding of the output feature axis
    return out[:B, :shared_dim]


def init_params(key, input_dim, shared_dim, hidden=_HIDDEN, dtype=jnp.float32):
    # Mimics PyTorch nn.Linear's uniform fan-in init; weights stored [in, out].
    k1, k2, k3, k4 = jax.random.split(key, 4)
    bound1 = 1.0 / (input_dim ** 0.5)
    bound2 = 1.0 / (hidden ** 0.5)
    w1 = jax.random.uniform(k1, (input_dim, hidden), dtype, -bound1, bound1)
    b1 = jax.random.uniform(k2, (hidden,), dtype, -bound1, bound1)
    w2 = jax.random.uniform(k3, (hidden, shared_dim), dtype, -bound2, bound2)
    b2 = jax.random.uniform(k4, (shared_dim,), dtype, -bound2, bound2)
    return w1, b1, w2, b2


def _reference(x, w1, b1, w2, b2):
    # Same numerics as the kernel: bf16 matmul operands, f32 accumulation.
    h = jnp.dot(x.astype(jnp.bfloat16), w1.astype(jnp.bfloat16),
                preferred_element_type=jnp.float32) + b1.reshape(1, -1)
    h = jnp.maximum(h, 0.0)
    return jnp.dot(h.astype(jnp.bfloat16), w2.astype(jnp.bfloat16),
                   preferred_element_type=jnp.float32) + b2.reshape(1, -1)


if __name__ == "__main__":
    key = jax.random.PRNGKey(0)
    kx, kx2, kp = jax.random.split(key, 3)

    B, input_dim, shared_dim = 8, 32, 32
    x = jax.random.normal(kx, (B, input_dim), jnp.float32)
    w1, b1, w2, b2 = init_params(kp, input_dim, shared_dim)

    out = jax.block_until_ready(image_encoder_forward(x, w1, b1, w2, b2))
    ref = _reference(x, w1, b1, w2, b2)
    assert out.shape == (B, shared_dim)
    assert jnp.allclose(out, ref, atol=1e-2, rtol=1e-2), "mismatch vs reference"

    # Exercise remainder handling + multi-step grid (B not a multiple of bm).
    B2 = 37
    x2 = jax.random.normal(kx2, (B2, input_dim), jnp.float32)
    out2 = jax.block_until_ready(
        image_encoder_forward(x2, w1, b1, w2, b2, bm=16))
    ref2 = _reference(x2, w1, b1, w2, b2)
    assert out2.shape == (B2, shared_dim)
    assert jnp.allclose(out2, ref2, atol=1e-2, rtol=1e-2), "mismatch (padded batch)"

    print("KERNEL_OK")
</pallas_src>

<mosaic_0001>
module attributes {stable_mosaic.version = 11 : i64} {
  func.func @mlp_kernel(%arg0: i32, %arg1: memref<16x32xbf16, #tpu.memory_space<vmem>>, %arg2: memref<32x128xbf16, #tpu.memory_space<vmem>>, %arg3: memref<1x128xf32, #tpu.memory_space<vmem>>, %arg4: memref<128x128xbf16, #tpu.memory_space<vmem>>, %arg5: memref<1x128xf32, #tpu.memory_space<vmem>>, %arg6: memref<16x128xf32, #tpu.memory_space<vmem>>) attributes {dimension_semantics = [#tpu.dimension_semantics<parallel>], iteration_bounds = array<i64: 1>, scalar_prefetch = 0 : i64, scratch_operands = 0 : i64, tpu.core_type = #tpu.core_type<tc>, window_params = [{transform_indices = @transform_0, window_bounds = array<i64: 16, 32>}, {pipeline_mode = #tpu.pipeline_mode<synchronous>, transform_indices = @transform_1, window_bounds = array<i64: 32, 128>}, {pipeline_mode = #tpu.pipeline_mode<synchronous>, transform_indices = @transform_2, window_bounds = array<i64: 1, 128>}, {pipeline_mode = #tpu.pipeline_mode<synchronous>, transform_indices = @transform_3, window_bounds = array<i64: 128, 128>}, {pipeline_mode = #tpu.pipeline_mode<synchronous>, transform_indices = @transform_4, window_bounds = array<i64: 1, 128>}, {transform_indices = @transform_5, window_bounds = array<i64: 16, 128>}]} {
    %c0 = arith.constant 0 : index
    %c0_0 = arith.constant 0 : index
    %0 = vector.load %arg1[%c0, %c0_0] : memref<16x32xbf16, #tpu.memory_space<vmem>>, vector<16x32xbf16>
    %c0_1 = arith.constant 0 : index
    %c0_2 = arith.constant 0 : index
    %1 = vector.load %arg2[%c0_1, %c0_2] : memref<32x128xbf16, #tpu.memory_space<vmem>>, vector<32x128xbf16>
    %cst = arith.constant dense<0.000000e+00> : vector<16x128xf32>
    %2 = tpu.matmul %0, %1, %cst {dimension_numbers = #tpu.dot_dimension_numbers<[1], [0], [0], [1], [0, 0, 1, 1], [], []>} : vector<16x32xbf16>, vector<32x128xbf16>, vector<16x128xf32> -> vector<16x128xf32>
    %c0_3 = arith.constant 0 : index
    %c0_4 = arith.constant 0 : index
    %3 = vector.load %arg3[%c0_3, %c0_4] : memref<1x128xf32, #tpu.memory_space<vmem>>, vector<1x128xf32>
    %4 = vector.broadcast %3 : vector<1x128xf32> to vector<16x128xf32>
    %5 = arith.addf %2, %4 : vector<16x128xf32>
    %cst_5 = arith.constant 0.000000e+00 : f32
    %6 = vector.broadcast %cst_5 : f32 to vector<16x128xf32>
    %7 = arith.maximumf %5, %6 : vector<16x128xf32>
    %8 = arith.truncf %7 : vector<16x128xf32> to vector<16x128xbf16>
    %c0_6 = arith.constant 0 : index
    %c0_7 = arith.constant 0 : index
    %9 = vector.load %arg4[%c0_6, %c0_7] : memref<128x128xbf16, #tpu.memory_space<vmem>>, vector<128x128xbf16>
    %cst_8 = arith.constant dense<0.000000e+00> : vector<16x128xf32>
    %10 = tpu.matmul %8, %9, %cst_8 {dimension_numbers = #tpu.dot_dimension_numbers<[1], [0], [0], [1], [0, 0, 1, 1], [], []>} : vector<16x128xbf16>, vector<128x128xbf16>, vector<16x128xf32> -> vector<16x128xf32>
    %c0_9 = arith.constant 0 : index
    %c0_10 = arith.constant 0 : index
    %11 = vector.load %arg5[%c0_9, %c0_10] : memref<1x128xf32, #tpu.memory_space<vmem>>, vector<1x128xf32>
    %12 = vector.broadcast %11 : vector<1x128xf32> to vector<16x128xf32>
    %13 = arith.addf %10, %12 : vector<16x128xf32>
    %c0_11 = arith.constant 0 : index
    %c0_12 = arith.constant 0 : index
    %14 = vector.load %arg6[%c0_11, %c0_12] : memref<16x128xf32, #tpu.memory_space<vmem>>, vector<16x128xf32>
    tpu.vector_store %arg6[%c0_11, %c0_12], %13 {strides = array<i32>} : memref<16x128xf32, #tpu.memory_space<vmem>>, vector<16x128xf32>,
    return
  }
  func.func @transform_0(%arg0: i32) -> (i32, i32) {
    %c0_i32 = arith.constant 0 : i32
    %c0_i32_0 = arith.constant 0 : i32
    return %arg0, %c0_i32 : i32, i32
  }
  func.func @transform_1(%arg0: i32) -> (i32, i32) {
    %c0_i32 = arith.constant 0 : i32
    %c0_i32_0 = arith.constant 0 : i32
    %c0_i32_1 = arith.constant 0 : i32
    return %c0_i32, %c0_i32_0 : i32, i32
  }
  func.func @transform_2(%arg0: i32) -> (i32, i32) {
    %c0_i32 = arith.constant 0 : i32
    %c0_i32_0 = arith.constant 0 : i32
    %c0_i32_1 = arith.constant 0 : i32
    return %c0_i32, %c0_i32_0 : i32, i32
  }
  func.func @transform_3(%arg0: i32) -> (i32, i32) {
    %c0_i32 = arith.constant 0 : i32
    %c0_i32_0 = arith.constant 0 : i32
    %c0_i32_1 = arith.constant 0 : i32
    return %c0_i32, %c0_i32_0 : i32, i32
  }
  func.func @transform_4(%arg0: i32) -> (i32, i32) {
    %c0_i32 = arith.constant 0 : i32
    %c0_i32_0 = arith.constant 0 : i32
    %c0_i32_1 = arith.constant 0 : i32
    return %c0_i32, %c0_i32_0 : i32, i32
  }
  func.func @transform_5(%arg0: i32) -> (i32, i32) {
    %c0_i32 = arith.constant 0 : i32
    %c0_i32_0 = arith.constant 0 : i32
    return %arg0, %c0_i32 : i32, i32
  }
}

</mosaic_0001>

<bundles_post_ra>
// kernel: tpu_custom_call.1
= control target key start
LH: loop header
LB: loop body
LE: loop exit
PB: predicated region body
PF: predicated region fallthrough
CT: control target
= control target key end

     0   :  { %10 = vsyncpa [#allocation3], 0  ;;  %s492_s0 = inlined_call_operand.hbm [shape: bf16[16,32], index: 0, kind: input, shape index: {}]   ;;  %s493_s1 = inlined_call_operand.hbm [shape: bf16[32,128], index: 1, kind: input, shape index: {}]   ;;  %s494_s2 = inlined_call_operand.vmem [shape: f32[1,128], index: 2, kind: input, shape index: {}]   ;;  %s495_s3 = inlined_call_operand.hbm [shape: bf16[128,128], index: 3, kind: input, shape index: {}]   ;;  %s496_s4 = inlined_call_operand.vmem [shape: f32[1,128], index: 4, kind: input, shape index: {}]   ;;  %s497_s5 = inlined_call_operand.hbm [shape: f32[16,128], index: 5, kind: output, shape index: {}]  }
   0x1   :  { %11 = vsyncpa [#allocation6], 0 }
   0x2   :  { %12 = vsyncpa [#allocation4], 0  ;;  %s434_s18 = smov [#allocation5]   ;;  %s435_s20 = smov [#allocation2]  }
   0x3   :  { %s30_s19 = sshll.u32 %s434_s18, 4  ;;  %s18_s21 = sshll.u32 %s435_s20, 4  ;;  %s31_s19 = int_to_ptr.vmem [resolvable:$true] %s30_s19  ;;  %s19_s21 = int_to_ptr.vmem [resolvable:$true] %s18_s21 }
   0x4   :  { %s356_s22 = scalar_lea.vmem %s31_s19, 256  ;;  %p361_p1 = scmp.lt.s32.totalorder %s31_s19, %s31_s19 }
   0x5   :  { %p357_p0 = scmp.ne.s32.totalorder %s31_s19, %s356_s22  ;;  %p362_p2 = scmp.lt.s32.totalorder %s356_s22, %s356_s22 }
   0x7   :  { %p363_p3 = por %p362_p2, %p361_p1 }
   0x9   :  { %p364_p4 = pnand %p363_p3, %p357_p0 }
   0xb   :  { %367 = shalt.err (!%p364_p4)
}
   0xc   :  { %s436_s23 = smov 64   ;;  %s437_s24 = smov 4  }
   0xd   :  { %36 = dma.hbm_to_vmem [thread:$0]  %s493_s1, 256, %s31_s19, [#allocation6], %s436_s23, %s436_s23, %s437_s24  }
   0xe   :  { %s376_s27 = scalar_lea.vmem %s19_s21, 128  ;;  %p381_p6 = scmp.lt.s32.totalorder %s19_s21, %s19_s21 }
   0xf   :  { %p377_p5 = scmp.ne.s32.totalorder %s19_s21, %s376_s27  ;;  %p382_p7 = scmp.lt.s32.totalorder %s376_s27, %s376_s27 }
  0x11   :  { %p383_p8 = por %p382_p7, %p381_p6 }
  0x13   :  { %p384_p9 = pnand %p383_p8, %p377_p5 }
  0x15   :  { %387 = shalt.err (!%p384_p9)
}
  0x16   :  { %24 = dma.hbm_to_vmem [thread:$0]  %s492_s0, 128, %s19_s21, [#allocation3], %s436_s23, %s436_s23, %s437_s24  }
  0x17   :  { %s438_s30 = smov [#allocation7]  }
  0x18   :  { %s44_s6 = sshll.u32 %s438_s30, 4  ;;  %s45_s6 = int_to_ptr.vmem [resolvable:$true] %s44_s6 }
  0x19   :  { %s396_s7 = scalar_lea.vmem %s45_s6, 1024  ;;  %p401_p11 = scmp.lt.s32.totalorder %s45_s6, %s45_s6 }
  0x1a   :  { %p397_p10 = scmp.ne.s32.totalorder %s45_s6, %s396_s7  ;;  %p402_p12 = scmp.lt.s32.totalorder %s396_s7, %s396_s7 }
  0x1c   :  { %p403_p13 = por %p402_p12, %p401_p11 }
  0x1e   :  { %p404_p0 = pnand %p403_p13, %p397_p10 }
  0x20   :  { %407 = shalt.err (!%p404_p0)
}
  0x21   :  { %50 = dma.hbm_to_vmem [thread:$0]  %s495_s3, 1024, %s45_s6, [#allocation6], %s436_s23, %s436_s23, %s437_s24  }
  0x22   :  { %428 = dma.done.wait [#allocation3], 128  }
  0x23   :  { %429 = vsyncadd [#allocation3], 4294967168 }
  0x24   :  { %430 = dma.done.wait [#allocation6], 1280  }
  0x25   :  { %431 = vsyncadd [#allocation6], 4294966016  ;;  %v439_v0 = vmov 0.0   ;;  %vm440_vm0 = vmmov 0   ;;  %v337_v1 = vld [vmem:[#allocation5 + $0x8] sm:$0xff]   ;;  %v338_v2 = vld [vmem:[#allocation5] sm:$0xff]  }
  0x26   :  { %299 = vmatprep.subr.bf16.mxu0 %v439_v0  ;;  %303 = vmatprep.mubr.msk.bf16.mxu0 %vm440_vm0, %v439_v0  ;;  %v340_v3 = vld [vmem:[#allocation7 + $0x38] sm:$0xff]   ;;  %v339_v4 = vld [vmem:[#allocation2] sm:$0xff]   ;;  %v341_v5 = vld [vmem:[#allocation7 + $0x30] sm:$0xff]   ;;  %vm93_vm1 = vcmask 261120   ;;  %s441_s11 = smov [#allocation8]  }
  0x27   :  { %307 = vmatprep.subr.bf16.mxu1 %v439_v0  ;;  %323 = vmatprep.mubr.msk.bf16.mxu1 %vm440_vm0, %v439_v0  ;;  %v342_v6 = vld [vmem:[#allocation7 + $0x28] sm:$0xff]   ;;  %v343_v7 = vld [vmem:[#allocation7 + $0x20] sm:$0xff]   ;;  %v344_v8 = vld [vmem:[#allocation7 + $0x18] sm:$0xff]   ;;  %s260_s12 = sshll.u32 %s441_s11, 4  ;;  %s261_s12 = int_to_ptr.vmem [resolvable:$true] %s260_s12 }
  0x28   :  { %300 = vmatpush3.bf16.msra.mxu0 %v337_v1  ;;  %308 = vmatpush3.bf16.msra.mxu1 %v340_v3  ;;  %v345_v9 = vld [vmem:[#allocation7 + $0x10] sm:$0xff]   ;;  %v346_v10 = vld [vmem:[#allocation7 + $0x8] sm:$0xff]   ;;  %v347_v11 = vld [vmem:[#allocation7] sm:$0xff]   ;;  %p413_p2 = scmp.lt.s32.totalorder %s261_s12, %s261_s12 }
  0x29   :  { %301 = vmatprep.subr.bf16.mxu0 %v439_v0  ;;  %309 = vmatprep.subr.bf16.mxu1 %v439_v0  ;;  %v273_v12 = vld [vmem:[%s494_s2] ss:$0 sm:$0xff]  ;;  %s408_s2 = scalar_lea.vmem %s261_s12, 256 }
  0x2a   :  { %v278_v22 = vld [vmem:[%s496_s4] ss:$0 sm:$0xff]  ;;  %p409_p1 = scmp.ne.s32.totalorder %s261_s12, %s408_s2  ;;  %p414_p3 = scmp.lt.s32.totalorder %s408_s2, %s408_s2 }
  0x2c   :  { %302 = vmatpush3.bf16.msra.mxu0 %v338_v2  ;;  %310 = vmatpush3.bf16.msra.mxu1 %v341_v5  ;;  %p415_p4 = por %p414_p3, %p413_p2 }
  0x2d   :  { %311 = vmatprep.subr.bf16.mxu1 %v439_v0 }
  0x2e   :  { %p416_p5 = pnand %p415_p4, %p409_p1 }
  0x2f   :  { %304 = vmatmul.mubr.msk.bf16.vlgmr.msra.gmra.mxu0 %vm93_vm1, %v339_v4 }
  0x30   :  { %312 = vmatpush3.bf16.msra.mxu1 %v342_v6 }
  0x31   :  { %313 = vmatprep.subr.bf16.mxu1 %v439_v0 }
  0x34   :  { %314 = vmatpush3.bf16.msra.mxu1 %v343_v7 }
  0x35   :  { %315 = vmatprep.subr.bf16.mxu1 %v439_v0 }
  0x38   :  { %316 = vmatpush3.bf16.msra.mxu1 %v344_v8 }
  0x39   :  { %317 = vmatprep.subr.bf16.mxu1 %v439_v0 }
  0x3c   :  { %318 = vmatpush3.bf16.msra.mxu1 %v345_v9 }
  0x3d   :  { %319 = vmatprep.subr.bf16.mxu1 %v439_v0 }
  0x40   :  { %320 = vmatpush3.bf16.msra.mxu1 %v346_v10 }
  0x41   :  { %321 = vmatprep.subr.bf16.mxu1 %v439_v0 }
  0x44   :  { %322 = vmatpush3.bf16.msra.mxu1 %v347_v11 }
  0xef   :  { %v131_v13 = vpop.f32.mrf.mxu0 }
  0xf0   :  { %v132_v15 = vadd.f32 %v273_v12, %v131_v13 }
  0xf1   :  { %v305_v14 = vpop.f32.mrf.mxu0 }
  0xf2   :  { %v138_v19 = vmax.f32 %v132_v15, 0.0 }
  0xf3   :  { %v134_v16 = vpop.f32.mrf.mxu0 }
  0xf4   :  { %v135_v17 = vadd.f32 %v273_v12, %v134_v16 }
  0xf5   :  { %v306_v18 = vpop.f32.mrf.mxu0 }
  0xf6   :  { %v139_v20 = vmax.f32 %v135_v17, 0.0 }
  0xf8   :  { %v140_v21 = vpack.c.bf16 %v139_v20, %v138_v19 }
  0xfa   :  { %324 = vmatmul.mubr.bf16.vlgmr.msra.gmra.mxu1 %v140_v21 }
 0x1ba   :  { %v246_v23 = vpop.f32.mrf.mxu1 }
 0x1bb   :  { %v247_v24 = vadd.f32 %v278_v22, %v246_v23 }
 0x1bc   :  { %v325_v25 = vpop.f32.mrf.mxu1 }
 0x1bd   :  { %253 = vst [vmem:[#allocation8] sm:$0xff] %v247_v24 }
 0x1be   :  { %v249_v26 = vpop.f32.mrf.mxu1 }
 0x1bf   :  { %v250_v27 = vadd.f32 %v278_v22, %v249_v26 }
 0x1c0   :  { %v326_v28 = vpop.f32.mrf.mxu1 }
 0x1c1   :  { %254 = vst [vmem:[#allocation8 + $0x8] sm:$0xff] %v250_v27 }
 0x1c2   :  { %419 = shalt.err (!%p416_p5)
}
 0x1c3   :  { %s442_s13 = smov 128   ;;  %s443_s4 = smov 8  }
 0x1c4   :  { %266 = dma.vmem_to_hbm [thread:$0]  %s261_s12, 256, %s497_s5, [#allocation4], %s442_s13, %s442_s13, %s443_s4  }
 0x1c5   :  { %432 = dma.done.wait [#allocation4], 256  }
 0x1c6   :  { %433 = vsyncadd [#allocation4], 4294967040 }
 0x1c7   :  { %270 = vsyncpa [#allocation3], 1 }
 0x1c8   :  { %271 = vsyncpa [#allocation6], 1 }
 0x1c9   :  { %272 = vsyncpa [#allocation4], 1 }

</bundles_post_ra>
